<compile_context>
chip_gen: v5e
topology: v5e:2x2
jax: 0.10.0
libtpu: 0.0.40
codegen_flags: <defaults>
</compile_context>

<pallas_src>
import jax
import jax.numpy as jnp
from jax import lax
from jax.experimental import pallas as pl
from jax.experimental.pallas import tpu as pltpu
from math import sqrt


def planar_flow_kernel(s_ref, z_ref, p_ref, x_ref, ld_ref):
    """One batch tile.

    s_ref  : (2,) f32 in SMEM          -> [b, u_hat.w]
    z_ref  : (T, D) VMEM tile of z
    p_ref  : (2, D) VMEM, resident     -> row 0 = w, row 1 = u_hat
    x_ref  : (T, D) output tile
    ld_ref : (1, 1, T) lane-dense log-det tile (f32)
    """
    b = s_ref[0]
    uw = s_ref[1]

    z = z_ref[...]                       # (T, D)
    p = p_ref[...]                       # (2, D) f32
    w = p[0:1, :]                        # (1, D)
    u_hat = p[1:2, :]                    # (1, D)

    # Column-form hidden for the x update (VPU mul + XLU lane reduce; no MXU
    # matmul with N=1 needed).
    hidden_col = jnp.sum(z * w, axis=-1, keepdims=True) + b        # (T, 1) f32
    h_col = jnp.tanh(hidden_col)                                    # EUP
    x_ref[...] = (z + u_hat * h_col).astype(x_ref.dtype)            # (T, D)

    # Row-form (lane-dense) hidden for the log-det: w (1,D) contracted with
    # z (T,D) on D -> (1, T) on the otherwise-idle MXU (NT / "q @ k^T" form).
    hidden_row = lax.dot_general(
        w.astype(z.dtype), z, (((1,), (1,)), ((), ())),
        preferred_element_type=jnp.float32) + b                     # (1, T) f32
    h_row = jnp.tanh(hidden_row)
    h_prime = 1.0 - h_row * h_row
    ld_row = jnp.log(jnp.abs(1.0 + uw * h_prime) + 1e-15)           # (1, T) f32
    ld_ref[...] = ld_row.reshape(1, 1, -1)                          # lane-dense store


def _round_up(x, m):
    return ((x + m - 1) // m) * m


def _cdiv(a, b):
    return -(-a // b)


def _default_vmem_limit():
    """Per-generation scoped-VMEM limit: ~96 MiB on v5e/v6e, ~48 MiB on v7x."""
    cap = None
    try:
        cap = getattr(pltpu.get_tpu_info(), "vmem_capacity_bytes", None)
    except Exception:
        cap = None
    if not cap:
        cap = 64 * 1024 * 1024          # conservative: v7x per-TensorCore VMEM
    return min(int(cap * 0.75), 100 * 1024 * 1024)


def planar_flow(z, w, u, b, *, tile_b=None, vmem_limit_bytes=None):
    """z: (B, D); w, u: (D,); b: (1,). Returns (x (B, D), log_det (B,) f32)."""
    B, D = z.shape
    dtype = z.dtype
    itemsize = jnp.dtype(dtype).itemsize

    # ---- parameter-only math, hoisted out of the per-tile kernel body ----
    w32 = w.astype(jnp.float32)
    u32 = u.astype(jnp.float32)
    wu = jnp.dot(w32, u32)
    m_wu = -1.0 + jax.nn.softplus(wu)                       # numerically stable
    u_hat = u32 + (m_wu - wu) * (w32 / (jnp.dot(w32, w32) + 1e-15))
    uw = jnp.dot(u_hat, w32)                                # scalar used in log_det
    scalars = jnp.stack([jnp.reshape(b, ()).astype(jnp.float32),
                         uw.astype(jnp.float32)])           # (2,) SMEM scalars
    params = jnp.stack([w32, u_hat], axis=0)                # (2, D) resident VMEM

    # ---- tile selection with correct VMEM accounting ----
    if vmem_limit_bytes is None:
        vmem_limit_bytes = _default_vmem_limit()

    D_pad = _round_up(D, 128)                 # VMEM lane padding of the last dim
    row_align = max(8, 32 // itemsize)        # 8 rows f32 / 16 bf16 / 32 int8
    budget = int(vmem_limit_bytes * 0.75)     # leave room for params/ld/misc
    bytes_per_row = 2 * 2 * D_pad * itemsize  # double-buffered z-in + x-out
    max_rows = max(row_align, budget // bytes_per_row)

    min_steps = 8                             # >= 4 steps per TensorCore on v7x
    step_cap = _round_up(_cdiv(B, min_steps), row_align)

    tile = min(tile_b if tile_b is not None else 1024, max_rows, step_cap)
    tile = max(row_align, (tile // row_align) * row_align)
    num_tiles = _cdiv(B, tile)

    cost = pl.CostEstimate(
        flops=int(6 * B * D),
        transcendentals=int(3 * B),
        bytes_accessed=int((2 * B * D + B) * itemsize + (2 * D + 2) * 4),
    )

    x, ld = pl.pallas_call(
        planar_flow_kernel,
        out_shape=(
            jax.ShapeDtypeStruct((B, D), dtype),
            jax.ShapeDtypeStruct((num_tiles, 1, tile), jnp.float32),
        ),
        grid=(num_tiles,),
        in_specs=[
            pl.BlockSpec(memory_space=pltpu.MemorySpace.SMEM),   # [b, u_hat.w]
            pl.BlockSpec((tile, D), lambda i: (i, 0)),           # z tile (streamed)
            pl.BlockSpec((2, D), lambda i: (0, 0)),              # [w; u_hat] resident
        ],
        out_specs=(
            pl.BlockSpec((tile, D), lambda i: (i, 0)),           # x tile
            pl.BlockSpec((1, 1, tile), lambda i: (i, 0, 0)),     # lane-dense log-det
        ),
        compiler_params=pltpu.CompilerParams(
            dimension_semantics=("parallel",),
            vmem_limit_bytes=vmem_limit_bytes,
        ),
        cost_estimate=cost,
    )(scalars, z, params)

    # Tail rows (>= B) of the log-det buffer come from padded reads; drop them.
    log_det = ld.reshape(num_tiles * tile)[:B]
    return x, log_det


def planar_flow_ref(z, w, u, b):
    """Pure-JAX reference mirroring the PyTorch forward exactly."""
    wu = jnp.dot(w, u)
    m_wu = -1.0 + jnp.log(1.0 + jnp.exp(wu))
    u_hat = u + (m_wu - wu) * (w / (jnp.linalg.norm(w) ** 2 + 1e-15))
    hidden = jnp.matmul(w, z.T) + b                              # (B,)
    x = z + u_hat[None, :] * jnp.tanh(hidden)[:, None]
    psi = (1.0 - jnp.tanh(hidden) ** 2)[None, :] * w[:, None]    # (D, B)
    log_det = jnp.log(jnp.abs(1.0 + jnp.matmul(u_hat, psi)) + 1e-15)
    return x, log_det


if __name__ == "__main__":
    # Small shapes, non-multiple batch: the auto tile picker gives 40-row tiles
    # and an 8-step grid, exercising the cdiv grid, tail-block padding, resident
    # parameter tiles and the lane-dense log-det output.
    B, D = 300, 16

    key = jax.random.PRNGKey(0)
    k_u, k_w, k_b, k_z = jax.random.split(key, 4)

    # Deterministic init matching nn.Parameter(torch.rand(...) / sqrt(D))
    u = jax.random.uniform(k_u, (D,), dtype=jnp.float32) / sqrt(D)
    w = jax.random.uniform(k_w, (D,), dtype=jnp.float32) / sqrt(D)
    b = jax.random.uniform(k_b, (1,), dtype=jnp.float32) / sqrt(D)
    z = jax.random.normal(k_z, (B, D), dtype=jnp.float32)

    # Keep the MXU operands bf16-representable so the lane-dense log-det path
    # compares bit-tightly with the f32 reference regardless of matmul mode.
    z = z.astype(jnp.bfloat16).astype(jnp.float32)
    w = w.astype(jnp.bfloat16).astype(jnp.float32)

    x, log_det = planar_flow(z, w, u, b)
    jax.block_until_ready((x, log_det))

    x_ref, ld_ref = planar_flow_ref(z, w, u, b)
    assert x.shape == (B, D) and log_det.shape == (B,)
    assert jnp.allclose(x, x_ref, atol=1e-5, rtol=1e-5), "x mismatch"
    assert jnp.allclose(log_det, ld_ref, atol=1e-5, rtol=1e-5), "log_det mismatch"

    print("KERNEL_OK")
</pallas_src>

<mosaic_0001>
module attributes {stable_mosaic.version = 11 : i64} {
  func.func @planar_flow_kernel(%arg0: i32, %arg1: memref<2xf32, #tpu.memory_space<smem>>, %arg2: memref<40x16xf32, #tpu.memory_space<vmem>>, %arg3: memref<2x16xf32, #tpu.memory_space<vmem>>, %arg4: memref<40x16xf32, #tpu.memory_space<vmem>>, %arg5: memref<1x1x40xf32, #tpu.memory_space<vmem>>) attributes {dimension_semantics = [#tpu.dimension_semantics<parallel>], iteration_bounds = array<i64: 8>, scalar_prefetch = 0 : i64, scratch_operands = 0 : i64, tpu.core_type = #tpu.core_type<tc>, window_params = [{transform_indices = @transform_0, window_bounds = array<i64: 2>}, {transform_indices = @transform_1, window_bounds = array<i64: 40, 16>}, {pipeline_mode = #tpu.pipeline_mode<synchronous>, transform_indices = @transform_2, window_bounds = array<i64: 2, 16>}, {transform_indices = @transform_3, window_bounds = array<i64: 40, 16>}, {transform_indices = @transform_4, window_bounds = array<i64: 1, 1, 40>}]} {
    %c0 = arith.constant 0 : index
    %0 = memref.load %arg1[%c0] : memref<2xf32, #tpu.memory_space<smem>>
    %c1 = arith.constant 1 : index
    %1 = memref.load %arg1[%c1] : memref<2xf32, #tpu.memory_space<smem>>
    %c0_0 = arith.constant 0 : index
    %c0_1 = arith.constant 0 : index
    %2 = vector.load %arg2[%c0_0, %c0_1] : memref<40x16xf32, #tpu.memory_space<vmem>>, vector<40x16xf32>
    %c0_2 = arith.constant 0 : index
    %c0_3 = arith.constant 0 : index
    %3 = vector.load %arg3[%c0_2, %c0_3] : memref<2x16xf32, #tpu.memory_space<vmem>>, vector<2x16xf32>
    %4 = vector.extract_strided_slice %3 {offsets = [0, 0], sizes = [1, 16], strides = [1, 1]} : vector<2x16xf32> to vector<1x16xf32>
    %5 = vector.extract_strided_slice %3 {offsets = [1, 0], sizes = [1, 16], strides = [1, 1]} : vector<2x16xf32> to vector<1x16xf32>
    %6 = vector.broadcast %4 : vector<1x16xf32> to vector<40x16xf32>
    %7 = arith.mulf %2, %6 : vector<40x16xf32>
    %cst = arith.constant dense<0.000000e+00> : vector<40xf32>
    %8 = vector.multi_reduction <add>, %7, %cst [1] : vector<40x16xf32> to vector<40xf32>
    %9 = vector.shape_cast %8 : vector<40xf32> to vector<40x1xf32>
    %10 = vector.broadcast %0 : f32 to vector<40x1xf32>
    %11 = arith.addf %9, %10 : vector<40x1xf32>
    %12 = math.tanh %11 : vector<40x1xf32>
    %13 = vector.broadcast %5 : vector<1x16xf32> to vector<40x16xf32>
    %14 = vector.broadcast %12 : vector<40x1xf32> to vector<40x16xf32>
    %15 = arith.mulf %13, %14 : vector<40x16xf32>
    %16 = arith.addf %2, %15 : vector<40x16xf32>
    %c0_4 = arith.constant 0 : index
    %c0_5 = arith.constant 0 : index
    %17 = vector.load %arg4[%c0_4, %c0_5] : memref<40x16xf32, #tpu.memory_space<vmem>>, vector<40x16xf32>
    tpu.vector_store %arg4[%c0_4, %c0_5], %16 {strides = array<i32>} : memref<40x16xf32, #tpu.memory_space<vmem>>, vector<40x16xf32>,
    %cst_6 = arith.constant dense<0.000000e+00> : vector<1x40xf32>
    %18 = tpu.matmul %4, %2, %cst_6 {dimension_numbers = #tpu.dot_dimension_numbers<[1], [1], [0], [0], [0, 0, 1, 0], [], []>} : vector<1x16xf32>, vector<40x16xf32>, vector<1x40xf32> -> vector<1x40xf32>
    %19 = vector.broadcast %0 : f32 to vector<1x40xf32>
    %20 = arith.addf %18, %19 : vector<1x40xf32>
    %21 = math.tanh %20 : vector<1x40xf32>
    %22 = arith.mulf %21, %21 : vector<1x40xf32>
    %cst_7 = arith.constant 1.000000e+00 : f32
    %23 = vector.broadcast %cst_7 : f32 to vector<1x40xf32>
    %24 = arith.subf %23, %22 : vector<1x40xf32>
    %25 = vector.broadcast %1 : f32 to vector<1x40xf32>
    %26 = arith.mulf %25, %24 : vector<1x40xf32>
    %cst_8 = arith.constant 1.000000e+00 : f32
    %27 = vector.broadcast %cst_8 : f32 to vector<1x40xf32>
    %28 = arith.addf %27, %26 : vector<1x40xf32>
    %29 = math.absf %28 : vector<1x40xf32>
    %cst_9 = arith.constant 1.000000e-15 : f32
    %30 = vector.broadcast %cst_9 : f32 to vector<1x40xf32>
    %31 = arith.addf %29, %30 : vector<1x40xf32>
    %32 = math.log %31 : vector<1x40xf32>
    %33 = vector.shape_cast %32 : vector<1x40xf32> to vector<1x1x40xf32>
    %c0_10 = arith.constant 0 : index
    %c0_11 = arith.constant 0 : index
    %c0_12 = arith.constant 0 : index
    %34 = vector.load %arg5[%c0_10, %c0_11, %c0_12] : memref<1x1x40xf32, #tpu.memory_space<vmem>>, vector<1x1x40xf32>
    tpu.vector_store %arg5[%c0_10, %c0_11, %c0_12], %33 {strides = array<i32>} : memref<1x1x40xf32, #tpu.memory_space<vmem>>, vector<1x1x40xf32>,
    return
  }
  func.func @transform_0(%arg0: i32) -> i32 {
    %c0_i32 = arith.constant 0 : i32
    %c0_i32_0 = arith.constant 0 : i32
    return %c0_i32 : i32
  }
  func.func @transform_1(%arg0: i32) -> (i32, i32) {
    %c0_i32 = arith.constant 0 : i32
    %c0_i32_0 = arith.constant 0 : i32
    return %arg0, %c0_i32 : i32, i32
  }
  func.func @transform_2(%arg0: i32) -> (i32, i32) {
    %c0_i32 = arith.constant 0 : i32
    %c0_i32_0 = arith.constant 0 : i32
    %c0_i32_1 = arith.constant 0 : i32
    return %c0_i32, %c0_i32_0 : i32, i32
  }
  func.func @transform_3(%arg0: i32) -> (i32, i32) {
    %c0_i32 = arith.constant 0 : i32
    %c0_i32_0 = arith.constant 0 : i32
    return %arg0, %c0_i32 : i32, i32
  }
  func.func @transform_4(%arg0: i32) -> (i32, i32, i32) {
    %c0_i32 = arith.constant 0 : i32
    %c0_i32_0 = arith.constant 0 : i32
    %c0_i32_1 = arith.constant 0 : i32
    return %arg0, %c0_i32, %c0_i32_0 : i32, i32, i32
  }
}

</mosaic_0001>

<bundles_post_ra>
// kernel: tpu_custom_call.1
= control target key start
LH: loop header
LB: loop body
LE: loop exit
PB: predicated region body
PF: predicated region fallthrough
CT: control target
= control target key end

     0   :  { %10 = vsyncpa [#allocation4], 0  ;;  %s1156_s0 = inlined_call_operand.vmem [shape: f32[2], index: 0, kind: input, shape index: {}]   ;;  %s1157_s1 = inlined_call_operand.vmem [shape: f32[300,16], index: 1, kind: input, shape index: {}]   ;;  %s1158_s2 = inlined_call_operand.vmem [shape: f32[2,16], index: 2, kind: input, shape index: {}]   ;;  %s1159_s3 = inlined_call_operand.vmem [shape: f32[300,16], index: 3, kind: output, shape index: {0}]   ;;  %s1160_s4 = inlined_call_operand.hbm [shape: f32[8,1,40], index: 4, kind: output, shape index: {1}]  }
   0x1   :  { %11 = vsyncpa [#allocation3], 0 }
   0x2   :  { %13 = vsyncpa [#allocation3 + $0x1], 0  ;;  %s977_s15 = smov 0   ;;  %s979_s16 = smov 0  }
   0x3   :  { %s981_s17 = smov 0   ;;  %s983_s18 = smov 0  }
   0x4 LB: > { %s998_s19 = sadd.s32 4294967295, %s917_s18   ;;  %s641_s20 = sadd.s32 4294967294, %s917_s18   ;;  %s917_s18 = sphi %s983_s18, %s1172_s18   ;;  %s913_s17 = sphi %s981_s17, %s1171_s17   ;;  %s909_s16 = sphi %s979_s16, %s1170_s16   ;;  %s905_s15 = sphi %s977_s15, %s1169_s15  }
   0x5   : > { %s1002_s21 = sadd.s32 1, %s917_s18   ;;  %s94_s22 = sadd.s32 1, %s913_s17 }
   0x6   : > { %s91_s23 = ssub.s32 %s917_s18, %s1002_s21  ;;  %p104_p0 = scmp.ne.s32.totalorder %s913_s17, %s909_s16 }
   0x7   : > { %p92_p1 = scmp.eq.s32.totalorder %s91_s23, 0  ;;  %p105_p2 = scmp.eq.s32.totalorder %s998_s19, 7 }
   0x8   : > { %p136_p3 = scmp.ne.s32.totalorder %s909_s16, %s905_s15  ;;  %p137_p4 = scmp.eq.s32.totalorder %s641_s20, 7 }
   0x9   : > { %s1013_s24 = scalar_select %p92_p1, %s913_s17, %s94_s22  }
   0xa   : > { %p1015_p5 = por %p105_p2, %p104_p0  ;;  %p1019_p6 = por %p137_p4, %p136_p3 }
   0xb   : > { %p642_p7 = scmp.ge.s32.totalorder %s917_s18, 1  ;;  %p144_p8 = scmp.lt.s32.totalorder %s917_s18, 9 }
   0xc   : > { %p683_p9 = scmp.eq.s32.totalorder %s998_s19, 0  ;;  %s156_s29 = sshll.u32 %s1156_s0, 4  ;;  %s157_s29 = int_to_ptr.vmem [resolvable:$true] %s156_s29 }
   0xd   : > { %p145_p10 = pnand %p642_p7, %p144_p8  ;;  %s951_s30 = smov [#allocation2]  }
   0xf   : > { %p675_p11 = pneg %p145_p10  ;;  %189 = sbr.rel (%p145_p10) target bundleno = 277 (0x115), region = 32 }
  0x11   : > { %p676_p12 = pnand %p683_p9, %p675_p11 }
  0x13   : > { %678 = dma.vmem_to_smem (!%p676_p12), %s157_s29, 16, %s951_s30, [#allocation4]  }
  0x14   : > { %896 = dma.done.wait (%p683_p9), [#allocation4], 16  }
  0x15   : > { %898 = vsyncadd (%p683_p9), [#allocation4], 4294967280 }
  0x16   : > { %196 = sfence }
  0x17   : > { %s1030_s5 = smul.u32 5, %s998_s19  ;;  %v250_v0 = vld [vmem:[%s1158_s2] sm:$0x3]  ;;  %vm257_vm0 = vcmask 130048   ;;  %s1052_s13 = sand.u32 1, %s909_s16   ;;  %vm348_vm1 = vcmask 319488  }
  0x18   : > { %v251_v1 = vperm.slane %v250_v0, 0  ;;  %s243_s14 = sld [smem:[#allocation2]]  ;;  %v284_v22 = vperm.slane %v250_v0, 1  ;;  %s668_s20 = smul.u32 40, %s1052_s13 }
  0x19   : > { %p229_p13 = scmp.lt.s32.totalorder %s1030_s5, 37  ;;  %s648_s23 = sld [smem:[#allocation2 + $0x1]] }
  0x1a   : > { %s1055_s22 = scalar_lea.vmem [#allocation5], %s668_s20   ;;  %s1161_s27 = scalar_lea.vmem [#allocation6], %s1052_s13 }
  0x1b   : > { %s230_s6 = scalar_select %p229_p13, %s1030_s5, 37 }
  0x1c   : > { %s362_s29 = ssub.s32 (%p1015_p5), 38, %s1030_s5  ;;  %s667_s30 = smul.u32 (%p1015_p5), 40, %s998_s19 }
  0x1d   : > { %s647_s9 = sshll.u32 %s230_s6, 3  ;;  %p363_p0 = scmp.lt.s32.totalorder (%p1015_p5), %s362_s29, 5 }
  0x1e   : > { %s232_s12 = scalar_lea.vmem %s1157_s1, %s647_s9  ;;  %v273_v17 = vstv %s243_s14  ;;  %s1078_s8 = scalar_lea.vmem (%p1015_p5), %s1159_s3, %s667_s30  }
  0x1f   : > { %v249_v2 = vld [vmem:[%s232_s12 + $0x20] sm:$0xff]  ;;  %v247_v3 = vld [vmem:[%s232_s12 + $0x10] sm:$0xff]  ;;  %v248_v7 = vld [vmem:[%s232_s12 + $0x18] sm:$0xff]  ;;  %v341_v48 = vstv %s648_s23 }
  0x20   : > { %649 = vmatpush.xpose.msk.msra.mxu0 %vm257_vm0, %v249_v2  ;;  %v245_v4 = vld [vmem:[%s232_s12] sm:$0xff]  ;;  %v254_v5 = vmul.f32 %v251_v1, %v247_v3  ;;  %v256_v6 = vmul.f32 %v251_v1, %v249_v2  ;;  %v246_v12 = vld [vmem:[%s232_s12 + $0x8] sm:$0xff]  ;;  %v255_v13 = vmul.f32 %v251_v1, %v248_v7 }
  0x21   : > { %v252_v8 = vmul.f32 %v251_v1, %v245_v4  ;;  %v253_v14 = vmul.f32 %v251_v1, %v246_v12 }
  0x22   : > { %v264_v9 = vsel %vm257_vm0, %v254_v5, 0.0  ;;  %v270_v10 = vsel %vm257_vm0, %v256_v6, 0.0  ;;  %v267_v15 = vsel %vm257_vm0, %v255_v13, 0.0 }
  0x23   : > { %265 = vadd.xlane.f32.xlu1 %v264_v9  ;;  %v258_v11 = vsel %vm257_vm0, %v252_v8, 0.0  ;;  %271 = vadd.xlane.f32.xlu2 %v270_v10  ;;  %v261_v16 = vsel %vm257_vm0, %v253_v14, 0.0 }
  0x24   : > { %650 = vmatpush.xpose.msk.msra.mxu0 %vm257_vm0, %v248_v7  ;;  %259 = vadd.xlane.f32.xlu0 %v258_v11 }
  0x28   : > { %651 = vmatpush.xpose.msk.msra.mxu0 %vm257_vm0, %v247_v3 }
  0x2b   : > { %268 = vadd.xlane.f32.xlu1 %v267_v15 }
  0x2c   : > { %652 = vmatpush.xpose.msk.msra.mxu0 %vm257_vm0, %v246_v12  ;;  %262 = vadd.xlane.f32.xlu0 %v261_v16 }
  0x30   : > { %653 = vmatpush.xpose.msk.msra.mxu0 %vm257_vm0, %v245_v4 }
  0x33   : > { %654 = vmatmul.msk.f32.vlgmr.msra.gmra.mxu0 %vm257_vm0, %v250_v0 }
  0x96   : > { %v266_v18 = vpop.xlane.xlu1 %265  ;;  %v272_v23 = vpop.xlane.xlu2 %271 }
  0x97   : > { %v260_v19 = vpop.xlane.xlu0 %259  ;;  %v276_v20 = vadd.f32 %v273_v17, %v266_v18  ;;  %v278_v26 = vadd.f32 %v273_v17, %v272_v23 }
  0x98   : > { %v274_v21 = vadd.f32 %v273_v17, %v260_v19 }
  0x99   : > { %784 = vtanh.f32 %v276_v20 }
  0x9a   : > { %786 = vtanh.f32 %v274_v21 }
  0x9b   : > { %788 = vtanh.f32 %v278_v26 }
  0x9e   : > { %v269_v24 = vpop.xlane.xlu1 %268 }
  0x9f   : > { %v785_v25 = vpop.eup %784  ;;  %v277_v27 = vadd.f32 %v273_v17, %v269_v24  ;;  %v263_v28 = vpop.xlane.xlu0 %262 }
  0xa0   : > { %v787_v29 = vpop.eup %786  ;;  %v287_v30 = vmul.f32 %v785_v25, %v284_v22  ;;  %v275_v31 = vadd.f32 %v273_v17, %v263_v28 }
  0xa1   : > { %v285_v32 = vmul.f32 %v787_v29, %v284_v22  ;;  %790 = vtanh.f32 %v277_v27  ;;  %v789_v35 = vpop.eup %788 }
  0xa2   : > { %v292_v33 = vadd.f32 %v287_v30, %v247_v3  ;;  %792 = vtanh.f32 %v275_v31  ;;  %v289_v37 = vmul.f32 %v789_v35, %v284_v22 }
  0xa3   : > { %v290_v34 = vadd.f32 %v285_v32, %v245_v4 }
  0xa4   : > { %297 = vst.msk [vmem:[%s1055_s22 + $0x10] sm:$0xff] %vm257_vm0, %v292_v33  ;;  %v294_v40 = vadd.f32 %v289_v37, %v249_v2 }
  0xa5   : > { %295 = vst.msk [vmem:[%s1055_s22] sm:$0xff] %vm257_vm0, %v290_v34 }
  0xa6   : > { %299 = vst.msk [vmem:[%s1055_s22 + $0x20] sm:$0xff] %vm257_vm0, %v294_v40 }
  0xa7   : > { %v791_v36 = vpop.eup %790 }
  0xa8   : > { %v793_v38 = vpop.eup %792  ;;  %v288_v39 = vmul.f32 %v791_v36, %v284_v22 }
  0xa9   : > { %v286_v41 = vmul.f32 %v793_v38, %v284_v22 }
  0xaa   : > { %v293_v42 = vadd.f32 %v288_v39, %v248_v7 }
  0xab   : > { %v291_v43 = vadd.f32 %v286_v41, %v246_v12 }
  0xac   : > { %298 = vst.msk [vmem:[%s1055_s22 + $0x18] sm:$0xff] %vm257_vm0, %v293_v42 }
  0xad   : > { %296 = vst.msk [vmem:[%s1055_s22 + $0x8] sm:$0xff] %vm257_vm0, %v291_v43 }
  0xb0   : > { %v335_v44 = vpop.f32.mrf.mxu0 }
  0xb1   : > { %v336_v45 = vadd.f32 %v335_v44, %v273_v17 }
  0xb3   : > { %794 = vtanh.f32 %v336_v45 }
  0xb9   : > { %v795_v46 = vpop.eup %794 }
  0xba   : > { %v339_v47 = vmul.f32 %v795_v46, %v795_v46 }
  0xbc   : > { %v340_v49 = vsub.f32 1.0, %v339_v47 }
  0xbe   : > { %v342_v50 = vmul.f32 %v341_v48, %v340_v49 }
  0xc0   : > { %v343_v51 = vadd.f32 1.0, %v342_v50 }
  0xc2   : > { %v344_v52 = vand.u32 2147483647, %v343_v51 }
  0xc4   : > { %v345_v53 = vadd.f32 1e-15, %v344_v52 }
  0xc6   : > { %796 = vlog2.f32 %v345_v53 }
  0xcb   : > { %360 = sbr.rel (!%p1015_p5) target bundleno = 262 (0x106), region = 40 }
  0xcc   : > { %v797_v54 = vpop.eup %796 }
  0xcd   : > { %v347_v55 = vmul.f32 0.6931472, %v797_v54 }
  0xcf   : > { %349 = vst.msk [vmem:[%s1161_s27] sm:$0x1] %vm348_vm1, %v347_v55 }
  0xd0   : > { %s1174_s29 = smov (!%p363_p0, %s362_s29), 5 }
  0xd1   : > { %s655_s9 = sshll.u32 %s1174_s29, 3 }
  0xd2   : > { %p658_p1 = scmp.eq.s32.totalorder %s655_s9, 0 }
  0xd3   : > { %798 = sdivrem.u32 (!%p658_p1), %s1174_s29, 5 }
  0xd4   : > { %371 = sbr.rel (%p658_p1) target bundleno = 262 (0x106), region = 44 }
  0xdc   : > { %s1084_s10 = spop.drf %798 }
  0xdd   : > { %s800_s11 = spop.drf %798  ;;  %p659_p2 = scmp.le.s32.totalorder %s1084_s10, 0 }
  0xde   : > { %s1164_s5 = smov (!%p659_p2), %s1078_s8  ;;  %s1165_s12 = smov (!%p659_p2), %s1055_s22 }
  0xdf   : > { %579 = sbr.rel (%p659_p2) target bundleno = 236 (0xec), region = 138  ;;  %s1093_s14 = smov (!%p659_p2), 0  }
  0xe0   : > { %s1095_s20 = smov (!%p659_p2), 0  }
  0xe4 LB: >> { %v444_v56 = vld [vmem:[%s925_s12] sm:$0xff]  ;;  %v446_v57 = vld [vmem:[%s925_s12 + $0x8] sm:$0xff]  ;;  %v448_v58 = vld [vmem:[%s925_s12 + $0x10] sm:$0xff]  ;;  %s454_s23 = sadd.s32 1, %s929_s14  ;;  %s438_s20 = sadd.s32 1, %s933_s20   ;;  %s933_s20 = sphi %s1095_s20, %s438_s20   ;;  %s929_s14 = sphi %s1093_s14, %s1166_s14   ;;  %s925_s12 = sphi %s1165_s12, %s459_s12   ;;  %s921_s5 = sphi %s1164_s5, %s460_s5  }
  0xe5   : >> { %445 = vst [vmem:[%s921_s5] sm:$0xff] %v444_v56  ;;  %v450_v59 = vld [vmem:[%s925_s12 + $0x18] sm:$0xff]  ;;  %p455_p3 = scmp.ge.s32.totalorder %s454_s23, %s1084_s10  ;;  %v452_v60 = vld [vmem:[%s925_s12 + $0x20] sm:$0xff]  ;;  %p437_p4 = scmp.ge.s32.totalorder %s438_s20, %s1084_s10 }
  0xe6   : >> { %447 = vst [vmem:[%s921_s5 + $0x8] sm:$0xff] %v446_v57 }
  0xe7   : >> { %449 = vst [vmem:[%s921_s5 + $0x10] sm:$0xff] %v448_v58  ;;  %s1176_s23 = smov (%p455_p3, %s454_s23), 0  ;;  %440 = sbr.rel (!%p437_p4) target bundleno = 228 (0xe4), region = 144 }
  0xe8   : >> { %451 = vst [vmem:[%s921_s5 + $0x18] sm:$0xff] %v450_v59  ;;  %s457_s30 = smul.u32 40, %s1176_s23  ;;  %s1166_s14 = smov %s1176_s23 }
  0xe9   : >> { %453 = vst [vmem:[%s921_s5 + $0x20] sm:$0xff] %v452_v60 }
  0xea   : >> { %s459_s12 = scalar_lea.vmem %s1055_s22, %s457_s30 [#allocation5]   ;;  %s460_s5 = scalar_lea.vmem %s1078_s8, %s457_s30  }
  0xec PF: > { %801 = sdivrem.u32 %s1174_s29, 5 }
  0xed   : > { %s660_s6 = smul.u32 40, %s1084_s10 }
  0xef   : > { %s1116_s7 = scalar_lea.vmem %s1055_s22, %s660_s6 [#allocation5]   ;;  %s467_s9 = scalar_lea.vmem %s1078_s8, %s660_s6  }
  0xf5   : > { %s802_s11 = spop.drf %801 }
  0xf6   : > { %s803_s30 = spop.drf %801 }
  0xf7   : > { %p662_p7 = scmp.le.s32.totalorder %s803_s30, 0 }
  0xf8   : > { %s935_s28 = smov (!%p662_p7), %s467_s9   ;;  %s939_s23 = smov (!%p662_p7), %s1116_s7  }
  0xf9   : > { %593 = sbr.rel (%p662_p7) target bundleno = 262 (0x106), region = 149  ;;  %s943_s27 = smov (!%p662_p7), 0  }
  0xfa   : > { %s947_s20 = smov (!%p662_p7), 0  }
  0xfe LB: >> { %v477_v61 = vld [vmem:[%s941_s23] sm:$0xff]  ;;  %s479_s22 = sadd.s32 1, %s945_s27  ;;  %s471_s20 = sadd.s32 1, %s949_s20   ;;  %s949_s20 = sphi %s947_s20, %s471_s20   ;;  %s945_s27 = sphi %s943_s27, %s944_s27   ;;  %s941_s23 = sphi %s939_s23, %s484_s23   ;;  %s937_s28 = sphi %s935_s28, %s485_s28  }
  0xff   : >> { %478 = vst [vmem:[%s937_s28] sm:$0xff] %v477_v61  ;;  %p480_p8 = scmp.ge.s32.totalorder %s479_s22, %s803_s30  ;;  %p470_p9 = scmp.ge.s32.totalorder %s471_s20, %s803_s30 }
 0x101   : >> { %s1178_s22 = smov (%p480_p8, %s479_s22), 0  ;;  %473 = sbr.rel (!%p470_p9) target bundleno = 254 (0xfe), region = 155 }
 0x102   : >> { %s663_s29 = sshll.u32 %s1178_s22, 3  ;;  %s944_s27 = smov %s1178_s22  }
 0x103   : >> { %s484_s23 = scalar_lea.vmem %s1116_s7, %s663_s29 [#allocation5]   ;;  %s485_s28 = scalar_lea.vmem %s467_s9, %s663_s29  }
 0x106 PF: > { %s494_s27 = scalar_lea.hbm %s1160_s4, %s998_s19  ;;  %s1167_s5 = scalar_lea.vmem [#allocation6], %s1052_s13 }
 0x107   : > { %s496_s12 = sshll.u32 %s1167_s5, 4  ;;  %s498_s14 = sshll.u32 %s494_s27, 4  ;;  %s497_s12 = int_to_ptr.vmem [resolvable:$true] %s496_s12  ;;  %s499_s14 = int_to_ptr.hbm [resolvable:$true] %s498_s14 }
 0x108   : > { %s833_s28 = sshra.s32 %s499_s14, 4  ;;  %s839_s11 = scalar_lea.hbm %s1160_s4, 8  ;;  %s834_s28 = int_to_ptr.hbm [resolvable:$true] %s833_s28 }
 0x109   : > { %s835_s6 = scalar_lea.hbm %s834_s28, 1  ;;  %p840_p13 = scmp.lt.s32.totalorder %s834_s28, %s1160_s4 }
 0x10a   : > { %p836_p10 = scmp.ne.s32.totalorder %s834_s28, %s835_s6  ;;  %p841_p0 = scmp.lt.s32.totalorder %s839_s11, %s835_s6 }
 0x10c   : > { %p837_p11 = pnand %p836_p10, %p1015_p5  ;;  %p842_p1 = por %p841_p0, %p840_p13 }
 0x10e   : > { %p838_p12 = pneg %p837_p11 }
 0x110   : > { %p843_p2 = pnand %p842_p1, %p838_p12 }
 0x112   : > { %846 = shalt.err (!%p843_p2)
}
 0x113   : > { %s1168_s19 = scalar_lea.sflag [#allocation3], %s1052_s13 }
 0x114   : > { %673 = dma.vmem_to_hbm [thread:$0]  (%p1015_p5), %s497_s12, 16, %s499_s14, %s1168_s19  }
 0x115 PF: > { %p685_p3 = scmp.ge.s32.totalorder %s917_s18, 2  ;;  %s517_s20 = sand.u32 1, %s905_s15  }
 0x116   : > { %s518_s22 = scalar_lea.sflag [#allocation3], %s517_s20 }
 0x117   : > { %p680_p4 = pnand %p685_p3, %p1019_p6 }
 0x119   : > { %p681_p7 = pneg %p680_p4 }
 0x11b   : > { %900 = dma.done.wait (%p681_p7), %s518_s22, 16  }
 0x11c   : > { %902 = vsyncadd (%p681_p7), %s518_s22, 4294967280  ;;  %p16_p8 = scmp.ge.s32.totalorder %s1002_s21, 10   ;;  %s1169_s15 = smov %s909_s16 }
 0x11d   : > { %s1170_s16 = smov %s913_s17  ;;  %s1171_s17 = smov %s1013_s24 }
 0x11e   : > { %s1172_s18 = smov %s1002_s21  ;;  %18 = sbr.rel (!%p16_p8) target bundleno = 4 (0x4), region = 166 }
 0x123   :  { %523 = vsyncpa [#allocation3], 1 }
 0x124   :  { %525 = vsyncpa [#allocation3 + $0x1], 1 }
 0x125   :  { %526 = vsyncpa [#allocation4], 1 }
 0x126   :  { %528 = vsyncpa [#allocation4 + $0x1], 1 }

</bundles_post_ra>
